<compile_context>
chip_gen: v5e
topology: v5e:2x2
jax: 0.10.0
libtpu: 0.0.40
codegen_flags: <defaults>
</compile_context>

<pallas_src>
import numpy as np
import jax
import jax.numpy as jnp
from jax import lax
from jax.experimental import pallas as pl
from jax.experimental.pallas import tpu as pltpu


def _sam_fused_kernel(x_ref, xs_ref, wg_ref, wrf_ref, wwf_ref, b_ref, out_ref):
    # x_ref  : (1, C, TN)      channels-first query / residual block
    # xs_ref : (1, 4, Np, C)   the four 2x2-pool phases of x, channels-last
    # wg_ref : (IC, C)         1x1 g-conv weight (bias folded into b_ref)
    # wrf_ref: (C, C)          folded residual_conv weight (acts on x)
    # wwf_ref: (C, IC)         folded residual_conv @ BN @ W-conv weight (acts on y)
    # b_ref  : (C, 1)          fully folded bias
    # out_ref: (1, C, TN)
    x = x_ref[0]                      # (C, TN)
    xs = xs_ref[0]                    # (4, Np, C)

    # --- fused 1x1 g-conv + 2x2 max-pool, and phi = 2x2 max-pool(x), in VMEM ---
    nt = (((1,), (1,)), ((), ()))     # contract last dims (NT matmul)
    g0 = lax.dot_general(wg_ref[...], xs[0], nt, preferred_element_type=jnp.float32)
    g1 = lax.dot_general(wg_ref[...], xs[1], nt, preferred_element_type=jnp.float32)
    g2 = lax.dot_general(wg_ref[...], xs[2], nt, preferred_element_type=jnp.float32)
    g3 = lax.dot_general(wg_ref[...], xs[3], nt, preferred_element_type=jnp.float32)
    g_pool = jnp.maximum(jnp.maximum(g0, g1), jnp.maximum(g2, g3))       # (IC, Np)
    phi_cl = jnp.maximum(jnp.maximum(xs[0], xs[1]),
                         jnp.maximum(xs[2], xs[3]))                      # (Np, C)

    # --- attention: s = f^T = phi^T @ theta, softmax over keys (sublane axis) ---
    s = jnp.dot(phi_cl, x, preferred_element_type=jnp.float32)           # (Np, TN)
    s = s - jnp.max(s, axis=0, keepdims=True)
    e = jnp.exp(s)
    p_t = e * pl.reciprocal(jnp.sum(e, axis=0, keepdims=True))           # (Np, TN) = p^T
    y = jnp.dot(g_pool, p_t, preferred_element_type=jnp.float32)         # (IC, TN)

    # --- folded (W-conv + BN + residual add + residual_conv): 2 matmuls + bias ---
    out_ref[0] = (jnp.dot(wrf_ref[...], x, preferred_element_type=jnp.float32)
                  + jnp.dot(wwf_ref[...], y, preferred_element_type=jnp.float32)
                  + b_ref[...])


def _pick_qtile(n):
    # Largest lane-aligned query tile <= 512 that divides N and leaves >= 2 tiles
    # (keeps VMEM bounded on v7x and gives megacore / both TCs parallel work).
    for t in (512, 256, 128):
        if n % t == 0 and n // t >= 2:
            return t
    return n


def sam_forward(x_nchw, params):
    B, C, H, W = x_nchw.shape
    IC = params['wg'].shape[0]
    N = H * W
    Hp, Wp = H // 2, W // 2
    Np = Hp * Wp

    # Channels-first flatten is a pure relabeling (no transpose, no copy).
    x_flat = x_nchw.reshape(B, C, N)

    # Four 2x2 pool phases of x, channels-last: x_sub[b, k, m, c] with
    # k = 2*dy + dx and m = hp*Wp + wp equal to x[b, c, 2*hp+dy, 2*wp+dx].
    x6 = x_nchw.reshape(B, C, Hp, 2, Wp, 2)
    phases = [jnp.transpose(x6[:, :, :, dy, :, dx], (0, 2, 3, 1)).reshape(B, Np, C)
              for dy in range(2) for dx in range(2)]
    x_sub = jnp.stack(phases, axis=1)                                    # (B, 4, Np, C)

    # ---- host-side affine folding (W-conv + eval BN + residual + residual_conv) ----
    eps = 1e-5
    bn_scale = params['bn_gamma'] / jnp.sqrt(params['bn_var'] + eps)     # (C,)
    bn_shift = params['bn_beta'] - params['bn_mean'] * bn_scale          # (C,)
    wr1 = params['wr'][:, :C]                                            # acts on x
    wr2 = params['wr'][:, C:]                                            # acts on z
    wr_fold = wr1 + wr2                                                  # (C, C)
    ww_fold = wr2 @ (bn_scale[:, None] * params['ww'])                   # (C, IC)
    # g bias commutes with the per-channel max-pool and sums out through the
    # softmax (rows sum to 1), so it folds into the output bias too.
    b_total = (wr2 @ (bn_scale * params['bw'] + bn_shift)
               + params['br'] + ww_fold @ params['bg'])                  # (C,)

    TN = _pick_qtile(N)
    grid = (B, N // TN)

    out_flat = pl.pallas_call(
        _sam_fused_kernel,
        out_shape=jax.ShapeDtypeStruct((B, C, N), jnp.float32),
        grid=grid,
        in_specs=[
            pl.BlockSpec((1, C, TN), lambda b, q: (b, 0, q)),        # x queries/residual
            pl.BlockSpec((1, 4, Np, C), lambda b, q: (b, 0, 0, 0)),  # pool phases (resident)
            pl.BlockSpec((IC, C), lambda b, q: (0, 0)),              # wg
            pl.BlockSpec((C, C), lambda b, q: (0, 0)),               # wr_fold
            pl.BlockSpec((C, IC), lambda b, q: (0, 0)),              # ww_fold
            pl.BlockSpec((C, 1), lambda b, q: (0, 0)),               # b_total
        ],
        out_specs=pl.BlockSpec((1, C, TN), lambda b, q: (b, 0, q)),
        compiler_params=pltpu.CompilerParams(
            dimension_semantics=("parallel", "parallel")),
    )(x_flat, x_sub, params['wg'], wr_fold, ww_fold, b_total.reshape(C, 1))

    return out_flat.reshape(B, C, H, W)


def sam_reference(x_nchw, params):
    """Pure-JAX reference mirroring the PyTorch forward (NCHW, eval-mode BN)."""
    B, C, H, W = x_nchw.shape
    IC = params['wg'].shape[0]
    hp = lax.Precision.HIGHEST

    def pool_nchw(t):
        return lax.reduce_window(t, -jnp.inf, lax.max, (1, 1, 2, 2), (1, 1, 2, 2), 'VALID')

    g_full = jnp.einsum('bchw,oc->bohw', x_nchw, params['wg'], precision=hp) \
        + params['bg'][None, :, None, None]
    g_x = pool_nchw(g_full).reshape(B, IC, -1).transpose(0, 2, 1)        # (B, Np, IC)
    theta = x_nchw.reshape(B, C, -1).transpose(0, 2, 1)                  # (B, N, C)
    phi = pool_nchw(x_nchw).reshape(B, C, -1)                            # (B, C, Np)
    f = jnp.einsum('bnc,bcm->bnm', theta, phi, precision=hp)
    fdc = jax.nn.softmax(f, axis=-1)
    y = jnp.einsum('bnm,bmi->bni', fdc, g_x, precision=hp)               # (B, N, IC)
    y = y.transpose(0, 2, 1).reshape(B, IC, H, W)
    wy = jnp.einsum('bihw,ci->bchw', y, params['ww'], precision=hp) \
        + params['bw'][None, :, None, None]
    inv_std = 1.0 / jnp.sqrt(params['bn_var'] + 1e-5)
    wy = (wy - params['bn_mean'][None, :, None, None]) * inv_std[None, :, None, None] \
        * params['bn_gamma'][None, :, None, None] + params['bn_beta'][None, :, None, None]
    z = wy + x_nchw
    cat = jnp.concatenate([x_nchw, z], axis=1)                           # (B, 2C, H, W)
    out = jnp.einsum('bkhw,ck->bchw', cat, params['wr'], precision=hp) \
        + params['br'][None, :, None, None]
    return out


if __name__ == "__main__":
    key = jax.random.PRNGKey(0)
    B, C, H, W = 2, 4, 16, 16
    IC = C // 2                       # inter_channels = in_channels // 2
    keys = jax.random.split(key, 12)

    x = jax.random.normal(keys[0], (B, C, H, W), dtype=jnp.float32)

    params = {
        # g: Conv2d(C, IC, 1x1)
        'wg': jax.random.normal(keys[1], (IC, C), jnp.float32) * 0.1,
        'bg': jax.random.normal(keys[2], (IC,), jnp.float32) * 0.1,
        # W: Conv2d(IC, C, 1x1) + BatchNorm2d(C) (eval mode).  __init__ sets
        # gamma=beta=0; here we use nonzero BN params so the attention path
        # actually contributes to the output and gets verified.
        'ww': jax.random.normal(keys[3], (C, IC), jnp.float32) * 0.1,
        'bw': jax.random.normal(keys[4], (C,), jnp.float32) * 0.1,
        'bn_gamma': 1.0 + 0.1 * jax.random.normal(keys[5], (C,), jnp.float32),
        'bn_beta': 0.1 * jax.random.normal(keys[6], (C,), jnp.float32),
        'bn_mean': 0.1 * jax.random.normal(keys[7], (C,), jnp.float32),
        'bn_var': 1.0 + 0.1 * jnp.abs(jax.random.normal(keys[8], (C,), jnp.float32)),
        # residual_conv: Conv2d(2C, C, 1x1)
        'wr': jax.random.normal(keys[9], (C, 2 * C), jnp.float32) * 0.1,
        'br': jax.random.normal(keys[10], (C,), jnp.float32) * 0.1,
    }

    out = jax.block_until_ready(sam_forward(x, params))
    ref = jax.block_until_ready(sam_reference(x, params))

    assert out.shape == (B, C, H, W)
    assert np.allclose(np.asarray(out), np.asarray(ref), rtol=1e-4, atol=1e-4), \
        "Pallas SAM output mismatch vs JAX reference"
    print("KERNEL_OK")
</pallas_src>

<mosaic_0001>
module attributes {stable_mosaic.version = 11 : i64} {
  func.func @_sam_fused_kernel(%arg0: i32, %arg1: i32, %arg2: memref<1x4x128xf32, #tpu.memory_space<vmem>>, %arg3: memref<1x4x64x4xf32, #tpu.memory_space<vmem>>, %arg4: memref<2x4xf32, #tpu.memory_space<vmem>>, %arg5: memref<4x4xf32, #tpu.memory_space<vmem>>, %arg6: memref<4x2xf32, #tpu.memory_space<vmem>>, %arg7: memref<4x1xf32, #tpu.memory_space<vmem>>, %arg8: memref<1x4x128xf32, #tpu.memory_space<vmem>>) attributes {dimension_semantics = [#tpu.dimension_semantics<parallel>, #tpu.dimension_semantics<parallel>], iteration_bounds = array<i64: 2, 2>, scalar_prefetch = 0 : i64, scratch_operands = 0 : i64, tpu.core_type = #tpu.core_type<tc>, window_params = [{transform_indices = @transform_0, window_bounds = array<i64: 1, 4, 128>}, {transform_indices = @transform_1, window_bounds = array<i64: 1, 4, 64, 4>}, {pipeline_mode = #tpu.pipeline_mode<synchronous>, transform_indices = @transform_2, window_bounds = array<i64: 2, 4>}, {pipeline_mode = #tpu.pipeline_mode<synchronous>, transform_indices = @transform_3, window_bounds = array<i64: 4, 4>}, {pipeline_mode = #tpu.pipeline_mode<synchronous>, transform_indices = @transform_4, window_bounds = array<i64: 4, 2>}, {pipeline_mode = #tpu.pipeline_mode<synchronous>, transform_indices = @transform_5, window_bounds = array<i64: 4, 1>}, {transform_indices = @transform_6, window_bounds = array<i64: 1, 4, 128>}]} {
    %c0 = arith.constant 0 : index
    %c0_0 = arith.constant 0 : index
    %c0_1 = arith.constant 0 : index
    %0 = vector.load %arg2[%c0, %c0_0, %c0_1] : memref<1x4x128xf32, #tpu.memory_space<vmem>>, vector<1x4x128xf32>
    %1 = vector.shape_cast %0 : vector<1x4x128xf32> to vector<4x128xf32>
    %c0_2 = arith.constant 0 : index
    %c0_3 = arith.constant 0 : index
    %c0_4 = arith.constant 0 : index
    %c0_5 = arith.constant 0 : index
    %2 = vector.load %arg3[%c0_2, %c0_3, %c0_4, %c0_5] : memref<1x4x64x4xf32, #tpu.memory_space<vmem>>, vector<1x4x64x4xf32>
    %3 = vector.shape_cast %2 : vector<1x4x64x4xf32> to vector<4x64x4xf32>
    %c0_6 = arith.constant 0 : index
    %c0_7 = arith.constant 0 : index
    %4 = vector.load %arg4[%c0_6, %c0_7] : memref<2x4xf32, #tpu.memory_space<vmem>>, vector<2x4xf32>
    %5 = vector.extract_strided_slice %3 {offsets = [0, 0, 0], sizes = [1, 64, 4], strides = [1, 1, 1]} : vector<4x64x4xf32> to vector<1x64x4xf32>
    %6 = vector.shape_cast %5 : vector<1x64x4xf32> to vector<64x4xf32>
    %cst = arith.constant dense<0.000000e+00> : vector<2x64xf32>
    %7 = tpu.matmul %4, %6, %cst {dimension_numbers = #tpu.dot_dimension_numbers<[1], [1], [0], [0], [0, 0, 1, 0], [], []>} : vector<2x4xf32>, vector<64x4xf32>, vector<2x64xf32> -> vector<2x64xf32>
    %c0_8 = arith.constant 0 : index
    %c0_9 = arith.constant 0 : index
    %8 = vector.load %arg4[%c0_8, %c0_9] : memref<2x4xf32, #tpu.memory_space<vmem>>, vector<2x4xf32>
    %9 = vector.extract_strided_slice %3 {offsets = [1, 0, 0], sizes = [1, 64, 4], strides = [1, 1, 1]} : vector<4x64x4xf32> to vector<1x64x4xf32>
    %10 = vector.shape_cast %9 : vector<1x64x4xf32> to vector<64x4xf32>
    %cst_10 = arith.constant dense<0.000000e+00> : vector<2x64xf32>
    %11 = tpu.matmul %8, %10, %cst_10 {dimension_numbers = #tpu.dot_dimension_numbers<[1], [1], [0], [0], [0, 0, 1, 0], [], []>} : vector<2x4xf32>, vector<64x4xf32>, vector<2x64xf32> -> vector<2x64xf32>
    %c0_11 = arith.constant 0 : index
    %c0_12 = arith.constant 0 : index
    %12 = vector.load %arg4[%c0_11, %c0_12] : memref<2x4xf32, #tpu.memory_space<vmem>>, vector<2x4xf32>
    %13 = vector.extract_strided_slice %3 {offsets = [2, 0, 0], sizes = [1, 64, 4], strides = [1, 1, 1]} : vector<4x64x4xf32> to vector<1x64x4xf32>
    %14 = vector.shape_cast %13 : vector<1x64x4xf32> to vector<64x4xf32>
    %cst_13 = arith.constant dense<0.000000e+00> : vector<2x64xf32>
    %15 = tpu.matmul %12, %14, %cst_13 {dimension_numbers = #tpu.dot_dimension_numbers<[1], [1], [0], [0], [0, 0, 1, 0], [], []>} : vector<2x4xf32>, vector<64x4xf32>, vector<2x64xf32> -> vector<2x64xf32>
    %c0_14 = arith.constant 0 : index
    %c0_15 = arith.constant 0 : index
    %16 = vector.load %arg4[%c0_14, %c0_15] : memref<2x4xf32, #tpu.memory_space<vmem>>, vector<2x4xf32>
    %17 = vector.extract_strided_slice %3 {offsets = [3, 0, 0], sizes = [1, 64, 4], strides = [1, 1, 1]} : vector<4x64x4xf32> to vector<1x64x4xf32>
    %18 = vector.shape_cast %17 : vector<1x64x4xf32> to vector<64x4xf32>
    %cst_16 = arith.constant dense<0.000000e+00> : vector<2x64xf32>
    %19 = tpu.matmul %16, %18, %cst_16 {dimension_numbers = #tpu.dot_dimension_numbers<[1], [1], [0], [0], [0, 0, 1, 0], [], []>} : vector<2x4xf32>, vector<64x4xf32>, vector<2x64xf32> -> vector<2x64xf32>
    %20 = arith.maximumf %7, %11 : vector<2x64xf32>
    %21 = arith.maximumf %15, %19 : vector<2x64xf32>
    %22 = arith.maximumf %20, %21 : vector<2x64xf32>
    %23 = vector.extract_strided_slice %3 {offsets = [0, 0, 0], sizes = [1, 64, 4], strides = [1, 1, 1]} : vector<4x64x4xf32> to vector<1x64x4xf32>
    %24 = vector.shape_cast %23 : vector<1x64x4xf32> to vector<64x4xf32>
    %25 = vector.extract_strided_slice %3 {offsets = [1, 0, 0], sizes = [1, 64, 4], strides = [1, 1, 1]} : vector<4x64x4xf32> to vector<1x64x4xf32>
    %26 = vector.shape_cast %25 : vector<1x64x4xf32> to vector<64x4xf32>
    %27 = arith.maximumf %24, %26 : vector<64x4xf32>
    %28 = vector.extract_strided_slice %3 {offsets = [2, 0, 0], sizes = [1, 64, 4], strides = [1, 1, 1]} : vector<4x64x4xf32> to vector<1x64x4xf32>
    %29 = vector.shape_cast %28 : vector<1x64x4xf32> to vector<64x4xf32>
    %30 = vector.extract_strided_slice %3 {offsets = [3, 0, 0], sizes = [1, 64, 4], strides = [1, 1, 1]} : vector<4x64x4xf32> to vector<1x64x4xf32>
    %31 = vector.shape_cast %30 : vector<1x64x4xf32> to vector<64x4xf32>
    %32 = arith.maximumf %29, %31 : vector<64x4xf32>
    %33 = arith.maximumf %27, %32 : vector<64x4xf32>
    %cst_17 = arith.constant dense<0.000000e+00> : vector<64x128xf32>
    %34 = tpu.matmul %33, %1, %cst_17 {dimension_numbers = #tpu.dot_dimension_numbers<[1], [0], [0], [1], [0, 0, 1, 1], [], []>} : vector<64x4xf32>, vector<4x128xf32>, vector<64x128xf32> -> vector<64x128xf32>
    %cst_18 = arith.constant dense<0xFF800000> : vector<128xf32>
    %35 = vector.multi_reduction <maximumf>, %34, %cst_18 [0] : vector<64x128xf32> to vector<128xf32>
    %36 = vector.shape_cast %35 : vector<128xf32> to vector<1x128xf32>
    %37 = vector.broadcast %36 : vector<1x128xf32> to vector<64x128xf32>
    %38 = arith.subf %34, %37 : vector<64x128xf32>
    %39 = math.exp %38 : vector<64x128xf32>
    %cst_19 = arith.constant dense<0.000000e+00> : vector<128xf32>
    %40 = vector.multi_reduction <add>, %39, %cst_19 [0] : vector<64x128xf32> to vector<128xf32>
    %41 = vector.shape_cast %40 : vector<128xf32> to vector<1x128xf32>
    %42 = tpu.reciprocal %41 : vector<1x128xf32> -> vector<1x128xf32>
    %43 = vector.broadcast %42 : vector<1x128xf32> to vector<64x128xf32>
    %44 = arith.mulf %39, %43 : vector<64x128xf32>
    %cst_20 = arith.constant dense<0.000000e+00> : vector<2x128xf32>
    %45 = tpu.matmul %22, %44, %cst_20 {dimension_numbers = #tpu.dot_dimension_numbers<[1], [0], [0], [1], [0, 0, 1, 1], [], []>} : vector<2x64xf32>, vector<64x128xf32>, vector<2x128xf32> -> vector<2x128xf32>
    %c0_21 = arith.constant 0 : index
    %c0_22 = arith.constant 0 : index
    %46 = vector.load %arg5[%c0_21, %c0_22] : memref<4x4xf32, #tpu.memory_space<vmem>>, vector<4x4xf32>
    %cst_23 = arith.constant dense<0.000000e+00> : vector<4x128xf32>
    %47 = tpu.matmul %46, %1, %cst_23 {dimension_numbers = #tpu.dot_dimension_numbers<[1], [0], [0], [1], [0, 0, 1, 1], [], []>} : vector<4x4xf32>, vector<4x128xf32>, vector<4x128xf32> -> vector<4x128xf32>
    %c0_24 = arith.constant 0 : index
    %c0_25 = arith.constant 0 : index
    %48 = vector.load %arg6[%c0_24, %c0_25] : memref<4x2xf32, #tpu.memory_space<vmem>>, vector<4x2xf32>
    %cst_26 = arith.constant dense<0.000000e+00> : vector<4x128xf32>
    %49 = tpu.matmul %48, %45, %cst_26 {dimension_numbers = #tpu.dot_dimension_numbers<[1], [0], [0], [1], [0, 0, 1, 1], [], []>} : vector<4x2xf32>, vector<2x128xf32>, vector<4x128xf32> -> vector<4x128xf32>
    %50 = arith.addf %47, %49 : vector<4x128xf32>
    %c0_27 = arith.constant 0 : index
    %c0_28 = arith.constant 0 : index
    %51 = vector.load %arg7[%c0_27, %c0_28] : memref<4x1xf32, #tpu.memory_space<vmem>>, vector<4x1xf32>
    %52 = vector.broadcast %51 : vector<4x1xf32> to vector<4x128xf32>
    %53 = arith.addf %50, %52 : vector<4x128xf32>
    %c0_29 = arith.constant 0 : index
    %c0_30 = arith.constant 0 : index
    %c0_31 = arith.constant 0 : index
    %54 = vector.load %arg8[%c0_29, %c0_30, %c0_31] : memref<1x4x128xf32, #tpu.memory_space<vmem>>, vector<1x4x128xf32>
    %55 = vector.shape_cast %54 : vector<1x4x128xf32> to vector<4x128xf32>
    %56 = vector.shape_cast %53 : vector<4x128xf32> to vector<1x4x128xf32>
    tpu.vector_store %arg8[%c0_29, %c0_30, %c0_31], %56 {strides = array<i32>} : memref<1x4x128xf32, #tpu.memory_space<vmem>>, vector<1x4x128xf32>,
    return
  }
  func.func @transform_0(%arg0: i32, %arg1: i32) -> (i32, i32, i32) {
    %c0_i32 = arith.constant 0 : i32
    %c0_i32_0 = arith.constant 0 : i32
    return %arg0, %c0_i32, %arg1 : i32, i32, i32
  }
  func.func @transform_1(%arg0: i32, %arg1: i32) -> (i32, i32, i32, i32) {
    %c0_i32 = arith.constant 0 : i32
    %c0_i32_0 = arith.constant 0 : i32
    %c0_i32_1 = arith.constant 0 : i32
    %c0_i32_2 = arith.constant 0 : i32
    return %arg0, %c0_i32, %c0_i32_0, %c0_i32_1 : i32, i32, i32, i32
  }
  func.func @transform_2(%arg0: i32, %arg1: i32) -> (i32, i32) {
    %c0_i32 = arith.constant 0 : i32
    %c0_i32_0 = arith.constant 0 : i32
    %c0_i32_1 = arith.constant 0 : i32
    return %c0_i32, %c0_i32_0 : i32, i32
  }
  func.func @transform_3(%arg0: i32, %arg1: i32) -> (i32, i32) {
    %c0_i32 = arith.constant 0 : i32
    %c0_i32_0 = arith.constant 0 : i32
    %c0_i32_1 = arith.constant 0 : i32
    return %c0_i32, %c0_i32_0 : i32, i32
  }
  func.func @transform_4(%arg0: i32, %arg1: i32) -> (i32, i32) {
    %c0_i32 = arith.constant 0 : i32
    %c0_i32_0 = arith.constant 0 : i32
    %c0_i32_1 = arith.constant 0 : i32
    return %c0_i32, %c0_i32_0 : i32, i32
  }
  func.func @transform_5(%arg0: i32, %arg1: i32) -> (i32, i32) {
    %c0_i32 = arith.constant 0 : i32
    %c0_i32_0 = arith.constant 0 : i32
    %c0_i32_1 = arith.constant 0 : i32
    return %c0_i32, %c0_i32_0 : i32, i32
  }
  func.func @transform_6(%arg0: i32, %arg1: i32) -> (i32, i32, i32) {
    %c0_i32 = arith.constant 0 : i32
    %c0_i32_0 = arith.constant 0 : i32
    return %arg0, %c0_i32, %arg1 : i32, i32, i32
  }
}

</mosaic_0001>

<bundles_post_ra>
// kernel: tpu_custom_call.1
= control target key start
LH: loop header
LB: loop body
LE: loop exit
PB: predicated region body
PF: predicated region fallthrough
CT: control target
= control target key end

     0   :  { %s1425_s0 = inlined_call_operand.vmem [shape: f32[2,4,256], index: 0, kind: input, shape index: {}]   ;;  %s1426_s1 = inlined_call_operand.vmem [shape: f32[2,4,64,4], index: 1, kind: input, shape index: {}]   ;;  %s1427_s2 = inlined_call_operand.vmem [shape: f32[2,4], index: 2, kind: input, shape index: {}]   ;;  %s1428_s3 = inlined_call_operand.vmem [shape: f32[4,4], index: 3, kind: input, shape index: {}]   ;;  %s1429_s4 = inlined_call_operand.vmem [shape: f32[4,2], index: 4, kind: input, shape index: {}]   ;;  %s1430_s5 = inlined_call_operand.vmem [shape: f32[4,1], index: 5, kind: input, shape index: {}]   ;;  %s1431_s6 = inlined_call_operand.hbm [shape: f32[2,4,256], index: 6, kind: output, shape index: {}]  }
   0x1   :  { %1432 = sst [smem:[#allocation5_spill]] %s1425_s0 }
   0x2   :  { %1433 = sst [smem:[#allocation6_spill]] %s1426_s1 }
   0x3   :  { %11 = vsyncpa [#allocation3], 0 }
   0x4   :  { %13 = vsyncpa [#allocation3 + $0x1], 0  ;;  %s1159_s21 = smov 0   ;;  %s1161_s22 = smov 0  }
   0x5   :  { %s1163_s23 = smov 0   ;;  %s1165_s24 = smov 0  }
   0x6   :  { %s1167_s25 = smov 0   ;;  %s1169_s26 = smov 0  }
   0x7   :  { %s1171_s27 = smov 0   ;;  %s1173_s28 = smov 0  }
   0x8 LB: > { %s870_s29 = sadd.s32 4294967295, %s1121_s28   ;;  %s871_s30 = sadd.s32 4294967294, %s1121_s28   ;;  %s1121_s28 = sphi %s1173_s28, %s19_s28   ;;  %s1117_s27 = sphi %s1171_s27, %s1444_s27   ;;  %s1113_s26 = sphi %s1169_s26, %s1443_s26   ;;  %s1109_s25 = sphi %s1167_s25, %s1442_s25   ;;  %s1105_s24 = sphi %s1165_s24, %s1441_s24   ;;  %s1101_s23 = sphi %s1163_s23, %s1440_s23   ;;  %s1097_s22 = sphi %s1161_s22, %s1439_s22   ;;  %s1093_s21 = sphi %s1159_s21, %s1438_s21  }
   0x9   : > { %s28_s7 = sadd.s32 1, %s1113_s26  ;;  %s31_s8 = sadd.s32 1, %s1117_s27 }
   0xa   : > { %p29_p0 = scmp.ge.s32.totalorder %s28_s7, 2  ;;  %p188_p1 = scmp.ne.s32.totalorder %s1101_s23, %s1097_s22 }
   0xb   : > { %p189_p2 = scmp.eq.s32.totalorder %s870_s29, 3  ;;  %p194_p5 = scmp.ne.s32.totalorder %s1097_s22, %s1093_s21 }
   0xc   : > { %s1446_s7 = smov (%p29_p0, %s28_s7), 0  ;;  %s1448_s8 = smov (!%p29_p0, %s31_s8), %s1117_s27 }
   0xd   : > { %s174_s9 = ssub.s32 %s1113_s26, %s1446_s7  ;;  %p1210_p3 = por %p189_p2, %p188_p1 }
   0xe   : > { %p33_p4 = scmp.ge.s32.totalorder %s1448_s8, 2  ;;  %p195_p6 = scmp.eq.s32.totalorder %s871_s30, 3 }
   0xf   : > { %p874_p7 = scmp.ge.s32.totalorder %s1121_s28, 1  ;;  %p244_p9 = scmp.lt.s32.totalorder %s1121_s28, 5 }
  0x10   : > { %s1450_s8 = smov (%p33_p4, %s1448_s8), 0  ;;  %p1219_p8 = por %p195_p6, %p194_p5 }
  0x11   : > { %s173_s12 = ssub.s32 %s1117_s27, %s1450_s8  ;;  %s178_s13 = sadd.s32 1, %s1101_s23 }
  0x12   : > { %s175_s14 = sor.u32 %s174_s9, %s173_s12  ;;  %p245_p10 = pnand %p874_p7, %p244_p9 }
  0x13   : > { %p176_p11 = scmp.eq.s32.totalorder %s175_s14, 0  ;;  %p282_p12 = scmp.lt.s32.totalorder (!%p245_p10), %s1109_s25, 1 }
  0x14   : > { %248 = sbr.rel (%p245_p10) target bundleno = 583 (0x247), region = 44  ;;  %p284_p13 = scmp.lt.s32.totalorder (!%p245_p10), %s1105_s24, 1 }
  0x15   : > { %s1228_s15 = scalar_select %p176_p11, %s1101_s23, %s178_s13  }
  0x16   : > { %s1436_s1 = sld [smem:[#allocation6_spill]] (!%p245_p10)  ;;  %s931_s13 = sshll.u32 (!%p245_p10), %s1109_s25, 1 }
  0x17   : > { %s1437_s0 = sld [smem:[#allocation5_spill]] (!%p245_p10)  ;;  %s279_s14 = sand.u32 (!%p245_p10), 1, %s1097_s22  }
  0x19   : > { %s283_s16 = scalar_select %p282_p12, %s1109_s25, 1  ;;  %vm560_vm0 = vcmask 1043456   ;;  %vm329_vm1 = vcmask 31744   ;;  %v328_v54 = vld [vmem:[%s1427_s2] sm:$0x3]  ;;  %vm677_vm6 = vcmask 523264  }
  0x1a   : > { %s285_s17 = scalar_select %p284_p13, %s1105_s24, 1  ;;  %vm707_vm7 = vcmask 1041408   ;;  %vm703_vm8 = vcmask 15360  }
  0x1b   : > { %s876_s18 = sshll.u32 %s283_s16, 1  ;;  %s935_s19 = sshll.u32 %s283_s16, 8 }
  0x1c   : > { %s287_s20 = sadd.s32 %s876_s18, %s285_s17  ;;  %s1237_s9 = scalar_lea.vmem %s1436_s1, %s935_s19 }
  0x1d   : > { %s877_s12 = sshll.u32 %s287_s20, 2  ;;  %v1240_v0 = vld [vmem:[%s1237_s9] sm:$0xff]  ;;  %v1261_v7 = vld [vmem:[%s1237_s9 + $0x8] sm:$0xff]  ;;  %v298_v15 = vld [vmem:[%s1237_s9 + $0x10] sm:$0xff]  ;;  %s875_s17 = sshll.u32 %s279_s14, 2 }
  0x1e   : > { %v1243_v1 = vld [vmem:[%s1237_s9 + $0x40] sm:$0xff]  ;;  %s289_s16 = scalar_lea.vmem %s1437_s0, %s877_s12  ;;  %v1266_v8 = vld [vmem:[%s1237_s9 + $0x48] sm:$0xff]  ;;  %v306_v16 = vld [vmem:[%s1237_s9 + $0x50] sm:$0xff]  ;;  %s281_s30 = scalar_lea.vmem [#allocation2], %s875_s17 }
  0x1f   : > { %v1246_v2 = vld [vmem:[%s1237_s9 + $0x80] sm:$0xff]  ;;  %v512_v4 = vmax.f32 %v1240_v0, %v1243_v1  ;;  %v1269_v9 = vld [vmem:[%s1237_s9 + $0x88] sm:$0xff]  ;;  %v513_v12 = vmax.f32 %v1261_v7, %v1266_v8  ;;  %v1282_v17 = vld [vmem:[%s1237_s9 + $0x90] sm:$0xff]  ;;  %v514_v19 = vmax.f32 %v298_v15, %v306_v16  ;;  %s777_s0 = sshll.u32 %s281_s30, 4  ;;  %s763_s25 = scalar_lea.sflag [#allocation3], %s279_s14  ;;  %s778_s0 = int_to_ptr.vmem [resolvable:$true] %s777_s0 }
  0x20   : > { %v1252_v3 = vld [vmem:[%s1237_s9 + $0xc0] sm:$0xff]  ;;  %v1272_v10 = vld [vmem:[%s1237_s9 + $0xc8] sm:$0xff]  ;;  %v322_v18 = vld [vmem:[%s1237_s9 + $0xd0] sm:$0xff] }
  0x21   : > { %v1256_v5 = vld [vmem:[%s289_s16] sm:$0xf]  ;;  %v520_v6 = vmax.f32 %v1246_v2, %v1252_v3  ;;  %v521_v13 = vmax.f32 %v1269_v9, %v1272_v10  ;;  %v522_v20 = vmax.f32 %v1282_v17, %v322_v18  ;;  %v299_v22 = vld [vmem:[%s1237_s9 + $0x18] sm:$0xff]  ;;  %v302_v34 = vld [vmem:[%s1237_s9 + $0x30] sm:$0xff]  ;;  %s773_s16 = sadd.s32 %s1105_s24, %s931_s13 }
  0x22   : > { %916 = vmatpush.msk.msra.mxu0 %vm560_vm0, %v1256_v5  ;;  %v307_v23 = vld [vmem:[%s1237_s9 + $0x58] sm:$0xff]  ;;  %v300_v31 = vld [vmem:[%s1237_s9 + $0x20] sm:$0xff]  ;;  %v310_v35 = vld [vmem:[%s1237_s9 + $0x70] sm:$0xff]  ;;  %s932_s18 = sshll.u32 %s773_s16, 2  ;;  %s1047_s16 = scalar_lea.hbm %s1431_s6, 16 }
  0x23   : > { %v528_v11 = vmax.f32 %v512_v4, %v520_v6  ;;  %v529_v14 = vmax.f32 %v513_v12, %v521_v13  ;;  %v530_v21 = vmax.f32 %v514_v19, %v522_v20  ;;  %v1290_v24 = vld [vmem:[%s1237_s9 + $0x98] sm:$0xff]  ;;  %v515_v26 = vmax.f32 %v299_v22, %v307_v23  ;;  %v308_v33 = vld [vmem:[%s1237_s9 + $0x60] sm:$0xff]  ;;  %v326_v38 = vld [vmem:[%s1237_s9 + $0xf0] sm:$0xff]  ;;  %s775_s29 = scalar_lea.hbm %s1431_s6, %s932_s18 }
  0x24   : > { %v323_v25 = vld [vmem:[%s1237_s9 + $0xd8] sm:$0xff]  ;;  %v316_v36 = vld [vmem:[%s1237_s9 + $0xa0] sm:$0xff]  ;;  %v516_v39 = vmax.f32 %v300_v31, %v308_v33  ;;  %v301_v41 = vld [vmem:[%s1237_s9 + $0x28] sm:$0xff]  ;;  %v518_v50 = vmax.f32 %v302_v34, %v310_v35  ;;  %s779_s1 = sshll.u32 %s775_s29, 4  ;;  %s780_s1 = int_to_ptr.hbm [resolvable:$true] %s779_s1 }
  0x25   : > { %917 = vmatmul.msk.f32.vlgmr.msra.gmra.mxu0 %vm329_vm1, %v528_v11  ;;  %v523_v27 = vmax.f32 %v1290_v24, %v323_v25  ;;  %v1296_v28 = vld [vmem:[%s1237_s9 + $0x38] sm:$0xff]  ;;  %v324_v37 = vld [vmem:[%s1237_s9 + $0xe0] sm:$0xff]  ;;  %v309_v42 = vld [vmem:[%s1237_s9 + $0x68] sm:$0xff]  ;;  %s1041_s24 = sshra.s32 %s780_s1, 4  ;;  %s1042_s24 = int_to_ptr.hbm [resolvable:$true] %s1041_s24 }
  0x26   : > { %v311_v29 = vld [vmem:[%s1237_s9 + $0x78] sm:$0xff]  ;;  %880 = vmatpush.xpose.msk.msra.mxu2 %vm329_vm1, %v1296_v28  ;;  %v524_v40 = vmax.f32 %v316_v36, %v324_v37  ;;  %v325_v43 = vld [vmem:[%s1237_s9 + $0xe8] sm:$0xff]  ;;  %v517_v46 = vmax.f32 %v301_v41, %v309_v42  ;;  %v318_v49 = vld [vmem:[%s1237_s9 + $0xb0] sm:$0xff]  ;;  %p1048_p4 = scmp.lt.s32.totalorder %s1042_s24, %s1431_s6 }
  0x27   : > { %v327_v30 = vld [vmem:[%s1237_s9 + $0xf8] sm:$0xff]  ;;  %889 = vmatpush.xpose.msk.msra.mxu1 %vm329_vm1, %v311_v29  ;;  %v531_v32 = vmax.f32 %v515_v26, %v523_v27  ;;  %v317_v45 = vld [vmem:[%s1237_s9 + $0xa8] sm:$0xff]  ;;  %v526_v51 = vmax.f32 %v318_v49, %v326_v38  ;;  %v519_v55 = vmax.f32 %v1296_v28, %v311_v29 }
  0x28   : > { %907 = vmatpush.xpose.msk.msra.mxu3 %vm329_vm1, %v327_v30  ;;  %v532_v44 = vmax.f32 %v516_v39, %v524_v40  ;;  %v525_v47 = vmax.f32 %v317_v45, %v325_v43  ;;  %v319_v53 = vld [vmem:[%s1237_s9 + $0xb8] sm:$0xff]  ;;  %s1043_s9 = scalar_lea.hbm %s1042_s24, 4 }
  0x29   : > { %v534_v52 = vmax.f32 %v518_v50, %v526_v51  ;;  %v527_v56 = vmax.f32 %v319_v53, %v327_v30  ;;  %p1044_p0 = scmp.ne.s32.totalorder %s1042_s24, %s1043_s9  ;;  %p1049_p5 = scmp.lt.s32.totalorder %s1047_s16, %s1043_s9 }
  0x2a   : > { %881 = vmatpush.xpose.msk.msra.mxu2 %vm329_vm1, %v302_v34  ;;  %v533_v48 = vmax.f32 %v517_v46, %v525_v47 }
  0x2b   : > { %890 = vmatpush.xpose.msk.msra.mxu1 %vm329_vm1, %v310_v35  ;;  %v535_v57 = vmax.f32 %v519_v55, %v527_v56  ;;  %p1045_p1 = pnand %p1044_p0, %p1210_p3  ;;  %p1050_p6 = por %p1049_p5, %p1048_p4 }
  0x2c   : > { %908 = vmatpush.xpose.msk.msra.mxu3 %vm329_vm1, %v326_v38 }
  0x2d   : > { %918 = vmatmul.msk.f32.gmra.mxu0 %vm329_vm1, %v529_v14  ;;  %p1046_p2 = pneg %p1045_p1 }
  0x2e   : > { %882 = vmatpush.xpose.msk.msra.mxu2 %vm329_vm1, %v301_v41 }
  0x2f   : > { %891 = vmatpush.xpose.msk.msra.mxu1 %vm329_vm1, %v309_v42  ;;  %p1051_p7 = pnand %p1050_p6, %p1046_p2 }
  0x30   : > { %909 = vmatpush.xpose.msk.msra.mxu3 %vm329_vm1, %v325_v43 }
  0x32   : > { %883 = vmatpush.xpose.msk.msra.mxu2 %vm329_vm1, %v300_v31 }
  0x33   : > { %892 = vmatpush.xpose.msk.msra.mxu1 %vm329_vm1, %v308_v33 }
  0x34   : > { %910 = vmatpush.xpose.msk.msra.mxu3 %vm329_vm1, %v324_v37 }
  0x35   : > { %919 = vmatmul.msk.f32.gmra.mxu0 %vm329_vm1, %v530_v21 }
  0x36   : > { %884 = vmatpush.xpose.msk.msra.mxu2 %vm329_vm1, %v299_v22 }
  0x37   : > { %893 = vmatpush.xpose.msk.msra.mxu1 %vm329_vm1, %v307_v23 }
  0x38   : > { %911 = vmatpush.xpose.msk.msra.mxu3 %vm329_vm1, %v323_v25 }
  0x3a   : > { %885 = vmatpush.xpose.msk.msra.mxu2 %vm329_vm1, %v298_v15 }
  0x3b   : > { %894 = vmatpush.xpose.msk.msra.mxu1 %vm329_vm1, %v306_v16 }
  0x3c   : > { %912 = vmatpush.xpose.msk.msra.mxu3 %vm329_vm1, %v322_v18 }
  0x3d   : > { %920 = vmatmul.msk.f32.gmra.mxu0 %vm329_vm1, %v531_v32 }
  0x3e   : > { %886 = vmatpush.xpose.msk.msra.mxu2 %vm329_vm1, %v1261_v7 }
  0x3f   : > { %895 = vmatpush.xpose.msk.msra.mxu1 %vm329_vm1, %v1266_v8 }
  0x40   : > { %913 = vmatpush.xpose.msk.msra.mxu3 %vm329_vm1, %v1272_v10 }
  0x42   : > { %887 = vmatpush.xpose.msk.msra.mxu2 %vm329_vm1, %v1240_v0 }
  0x43   : > { %896 = vmatpush.xpose.msk.msra.mxu1 %vm329_vm1, %v1243_v1 }
  0x44   : > { %914 = vmatpush.xpose.msk.msra.mxu3 %vm329_vm1, %v1252_v3 }
  0x45   : > { %921 = vmatmul.msk.f32.gmra.mxu0 %vm329_vm1, %v532_v44  ;;  %888 = vmatmul.msk.f32.vlgmr.msra.gmra.mxu2 %vm329_vm1, %v328_v54 }
  0x46   : > { %898 = vmatpush.xpose.msk.msrb.mxu2 %vm329_vm1, %v319_v53  ;;  %897 = vmatmul.msk.f32.vlgmr.msra.gmra.mxu1 %vm329_vm1, %v328_v54 }
  0x47   : > { %915 = vmatmul.msk.f32.vlgmr.msra.gmra.mxu3 %vm329_vm1, %v328_v54 }
  0x4a   : > { %899 = vmatpush.xpose.msk.msrb.mxu2 %vm329_vm1, %v318_v49 }
  0x4d   : > { %922 = vmatmul.msk.f32.gmra.mxu0 %vm329_vm1, %v533_v48 }
  0x4e   : > { %900 = vmatpush.xpose.msk.msrb.mxu2 %vm329_vm1, %v317_v45 }
  0x52   : > { %901 = vmatpush.xpose.msk.msrb.mxu2 %vm329_vm1, %v316_v36 }
  0x55   : > { %923 = vmatmul.msk.f32.gmra.mxu0 %vm329_vm1, %v534_v52 }
  0x56   : > { %902 = vmatpush.xpose.msk.msrb.mxu2 %vm329_vm1, %v1290_v24 }
  0x5a   : > { %903 = vmatpush.xpose.msk.msrb.mxu2 %vm329_vm1, %v1282_v17 }
  0x5d   : > { %924 = vmatmul.msk.f32.gmra.mxu0 %vm329_vm1, %v535_v57 }
  0x5e   : > { %904 = vmatpush.xpose.msk.msrb.mxu2 %vm329_vm1, %v1269_v9 }
  0x62   : > { %905 = vmatpush.xpose.msk.msrb.mxu2 %vm329_vm1, %v1246_v2 }
  0x65   : > { %906 = vmatmul.msk.f32.vlgmr.msrb.gmra.mxu2 %vm329_vm1, %v328_v54 }
  0xa2   : > { %v581_v58 = vpop.f32.mrf.mxu0 }
  0xaa   : > { %v584_v59 = vpop.f32.mrf.mxu0 }
  0xb2   : > { %v587_v60 = vpop.f32.mrf.mxu0 }
  0xba   : > { %v590_v61 = vpop.f32.mrf.mxu0 }
  0xc2   : > { %v593_v62 = vpop.f32.mrf.mxu0 }
  0xc3   : > { %v605_v4 = vmax.f32 %v581_v58, %v593_v62 }
  0xca   : > { %v596_v63 = vpop.f32.mrf.mxu0 }
  0xcb   : > { %v606_v1 = vmax.f32 %v584_v59, %v596_v63 }
  0xcd   : > { %v609_v8 = vmax.f32 %v605_v4, %v606_v1 }
  0xd2   : > { %v599_v0 = vpop.f32.mrf.mxu0 }
  0xd3   : > { %v607_v6 = vmax.f32 %v587_v60, %v599_v0 }
  0xda   : > { %v602_v3 = vpop.f32.mrf.mxu0 }
  0xdb   : > { %v608_v7 = vmax.f32 %v590_v61, %v602_v3 }
  0xdd   : > { %v610_v10 = vmax.f32 %v607_v6, %v608_v7  ;;  %v418_v6 = vpop.f32.mrf.mxu1 }
  0xdf   : > { %v611_v9 = vmax.f32 %v609_v8, %v610_v10  ;;  %v506_v8 = vpop.f32.mrf.mxu3 }
  0xe1   : > { %v612_v11 = vrot.slane %v611_v9, 4 }
  0xe3   : > { %v613_v12 = vmax.f32 %v611_v9, %v612_v11 }
  0xe5   : > { %v614_v2 = vrot.slane %v613_v12, 2 }
  0xe7   : > { %v615_v13 = vmax.f32 %v613_v12, %v614_v2 }
  0xe9   : > { %v616_v14 = vrot.slane %v615_v13, 1 }
  0xeb   : > { %v617_v15 = vmax.f32 %v615_v13, %v616_v14 }
  0xed   : > { %v618_v16 = vsub.f32 %v581_v58, %v617_v15  ;;  %v619_v17 = vsub.f32 %v584_v59, %v617_v15  ;;  %v620_v18 = vsub.f32 %v587_v60, %v617_v15  ;;  %v621_v19 = vsub.f32 %v590_v61, %v617_v15  ;;  %v374_v61 = vpop.f32.mrf.mxu2 }
  0xee   : > { %v622_v22 = vsub.f32 %v593_v62, %v617_v15  ;;  %v623_v24 = vsub.f32 %v596_v63, %v617_v15  ;;  %v624_v26 = vsub.f32 %v599_v0, %v617_v15  ;;  %v625_v28 = vsub.f32 %v602_v3, %v617_v15  ;;  %v754_v15 = vld [vmem:[%s1430_s5] sm:$0xf] }
  0xef   : > { %v626_v20 = vmul.f32 1.442695, %v618_v16  ;;  %v628_v21 = vmul.f32 1.442695, %v619_v17  ;;  %v630_v23 = vmul.f32 1.442695, %v620_v18  ;;  %v509_v11 = vmax.f32 %v374_v61, %v418_v6 }
  0xf0   : > { %v632_v25 = vmul.f32 1.442695, %v621_v19  ;;  %v634_v27 = vmul.f32 1.442695, %v622_v22  ;;  %v636_v29 = vmul.f32 1.442695, %v623_v24 }
  0xf1   : > { %1009 = vpow2.f32 %v626_v20  ;;  %v638_v32 = vmul.f32 1.442695, %v624_v26  ;;  %v640_v35 = vmul.f32 1.442695, %v625_v28  ;;  %v1123_v16 = vmov 0  }
  0xf2   : > { %1011 = vpow2.f32 %v628_v21  ;;  %1008 = vset.pattern.permute.xlu0 %v1123_v16  ;;  %v702_v17 = vld [vmem:[%s1429_s4] sm:$0xf] }
  0xf3   : > { %1013 = vpow2.f32 %v630_v23  ;;  %757 = vperm.xlu0 %1008, %v754_v15   ;;  %v701_v19 = vld [vmem:[%s1428_s3] sm:$0xf] }
  0xf4   : > { %1015 = vpow2.f32 %v632_v25 }
  0xf5   : > { %1017 = vpow2.f32 %v634_v27  ;;  %v462_v7 = vpop.f32.mrf.mxu2 }
  0xf6   : > { %1019 = vpow2.f32 %v636_v29  ;;  %v510_v12 = vmax.f32 %v462_v7, %v506_v8 }
  0xf7   : > { %v1010_v30 = vpop.eup %1009  ;;  %1021 = vpow2.f32 %v638_v32 }
  0xf8   : > { %v1012_v31 = vpop.eup %1011  ;;  %1023 = vpow2.f32 %v640_v35  ;;  %v511_v14 = vmax.f32 %v509_v11, %v510_v12 }
  0xf9   : > { %v642_v33 = vadd.f32 %v1012_v31, %v1010_v30  ;;  %v1014_v34 = vpop.eup %1013 }
  0xfa   : > { %v1016_v37 = vpop.eup %1015 }
  0xfb   : > { %v643_v36 = vadd.f32 %v1014_v34, %v642_v33  ;;  %v1018_v39 = vpop.eup %1017 }
  0xfc   : > { %v1020_v41 = vpop.eup %1019 }
  0xfd   : > { %v644_v38 = vadd.f32 %v1016_v37, %v643_v36  ;;  %v1022_v43 = vpop.eup %1021 }
  0xfe   : > { %v1024_v45 = vpop.eup %1023 }
  0xff   : > { %v645_v40 = vadd.f32 %v1018_v39, %v644_v38 }
 0x101   : > { %v646_v42 = vadd.f32 %v1020_v41, %v645_v40 }
 0x103   : > { %v647_v44 = vadd.f32 %v1022_v43, %v646_v42 }
 0x105   : > { %v648_v46 = vadd.f32 %v1024_v45, %v647_v44 }
 0x107   : > { %v649_v47 = vrot.slane %v648_v46, 4 }
 0x109   : > { %v650_v48 = vadd.f32 %v649_v47, %v648_v46 }
 0x10b   : > { %v651_v49 = vrot.slane %v650_v48, 2 }
 0x10d   : > { %v652_v50 = vadd.f32 %v651_v49, %v650_v48 }
 0x10f   : > { %v653_v51 = vrot.slane %v652_v50, 1 }
 0x111   : > { %v654_v52 = vadd.f32 %v653_v51, %v652_v50 }
 0x113   : > { %1025 = vrcp.f32 %v654_v52  ;;  %v666_v56 = vand.u32 2147483648, %v654_v52  ;;  %v664_v58 = vand.u32 2147483647, %v654_v52  ;;  %vm660_vm3 = vweird.f32 %v654_v52 }
 0x115   : > { %v667_v60 = vor.u32 1.1754944e-38, %v666_v56  ;;  %vm665_vm5 = vcmp.eq.f32.partialorder %v664_v58, 8.507059e+37 }
 0x119   : > { %v1026_v53 = vpop.eup %1025 }
 0x11a   : > { %v656_v54 = vmul.f32 %v1026_v53, %v654_v52  ;;  %vm661_vm2 = vweird.f32 %v1026_v53 }
 0x11b   : > { %vm662_vm4 = vmor %vm660_vm3, %vm661_vm2 }
 0x11c   : > { %v657_v55 = vsub.f32 1.0, %v656_v54 }
 0x11e   : > { %v658_v57 = vmul.f32 %v1026_v53, %v657_v55 }
 0x120   : > { %v659_v59 = vadd.f32 %v1026_v53, %v658_v57 }
 0x122   : > { %v663_v62 = vsel %vm662_vm4, %v1026_v53, %v659_v59 }
 0x123   : > { %v668_v63 = vsel %vm665_vm5, %v667_v60, %v663_v62 }
 0x124   : > { %v676_v0 = vmul.f32 %v1024_v45, %v668_v63  ;;  %v675_v1 = vmul.f32 %v1022_v43, %v668_v63  ;;  %v674_v3 = vmul.f32 %v1020_v41, %v668_v63  ;;  %v673_v4 = vmul.f32 %v1018_v39, %v668_v63 }
 0x125   : > { %v672_v10 = vmul.f32 %v1016_v37, %v668_v63  ;;  %v671_v9 = vmul.f32 %v1014_v34, %v668_v63  ;;  %v670_v2 = vmul.f32 %v1012_v31, %v668_v63  ;;  %v669_v13 = vmul.f32 %v1010_v30, %v668_v63 }
 0x126   : > { %689 = vmatpush.msrb.mxu1 %v676_v0 }
 0x128   : > { %690 = vmatpush.msrb.mxu1 %v675_v1 }
 0x12a   : > { %691 = vmatpush.msrb.mxu1 %v674_v3 }
 0x12c   : > { %692 = vmatpush.msrb.mxu1 %v673_v4 }
 0x12e   : > { %693 = vmatpush.msrb.mxu1 %v672_v10 }
 0x130   : > { %694 = vmatpush.msrb.mxu1 %v671_v9 }
 0x132   : > { %695 = vmatpush.msrb.mxu1 %v670_v2 }
 0x134   : > { %696 = vmatpush.msrb.mxu1 %v669_v13 }
 0x135   : > { %925 = vmatmul.msk.f32.vlgmr.msrb.gmra.mxu1 %vm677_vm6, %v511_v14 }
 0x165   : > { %v758_v22 = vpop.permute.xlu0 %757 }
 0x1b2   : > { %v698_v18 = vpop.f32.mrf.mxu1 }
 0x1b3   : > { %926 = vmatpush.msk.msrb.mxu3 %vm707_vm7, %v698_v18 }
 0x1b4   : > { %927 = vmatmul.msk.f32.vlgmr.msrb.gmra.mxu3 %vm703_vm8, %v702_v17 }
 0x1b5   : > { %928 = vmatpush.msk.msra.mxu3 %vm560_vm0, %v1256_v5 }
 0x1bc   : > { %929 = vmatmul.msk.f32.vlgmr.msra.gmra.mxu3 %vm329_vm1, %v701_v19 }
 0x237   : > { %v728_v20 = vpop.f32.mrf.mxu3 }
 0x23f   : > { %v751_v21 = vpop.f32.mrf.mxu3 }
 0x240   : > { %v752_v5 = vadd.f32 %v751_v21, %v728_v20 }
 0x242   : > { %v760_v23 = vadd.f32 %v758_v22, %v752_v5 }
 0x244   : > { %761 = vst [vmem:[%s281_s30] sm:$0xf] %v760_v23 }
 0x245   : > { %1054 = shalt.err (!%p1051_p7)
}
 0x246   : > { %936 = dma.vmem_to_hbm [thread:$0]  (%p1210_p3), %s778_s0, 64, %s780_s1, %s763_s25  }
 0x247 PF: > { %p942_p9 = scmp.ge.s32.totalorder %s1121_s28, 2  ;;  %s791_s14 = sand.u32 1, %s1093_s21  }
 0x248   : > { %s792_s19 = scalar_lea.sflag [#allocation3], %s791_s14 }
 0x249   : > { %p939_p10 = pnand %p942_p9, %p1219_p8 }
 0x24b   : > { %p940_p11 = pneg %p939_p10 }
 0x24d   : > { %1088 = dma.done.wait (%p940_p11), %s792_s19, 64  }
 0x24e   : > { %1090 = vsyncadd (%p940_p11), %s792_s19, 4294967232  ;;  %s19_s28 = sadd.s32 1, %s1121_s28   ;;  %s1438_s21 = smov %s1097_s22 }
 0x24f   : > { %p16_p12 = scmp.ge.s32.totalorder %s19_s28, 6   ;;  %s1439_s22 = smov %s1101_s23 }
 0x250   : > { %s1440_s23 = smov %s1228_s15  ;;  %s1441_s24 = smov %s1113_s26 }
 0x251   : > { %s1442_s25 = smov %s1117_s27  ;;  %s1443_s26 = smov %s1446_s7 }
 0x252   : > { %s1444_s27 = smov %s1450_s8  ;;  %18 = sbr.rel (!%p16_p12) target bundleno = 8 (0x8), region = 82 }
 0x257   :  { %798 = vsyncpa [#allocation3], 1 }
 0x258   :  { %800 = vsyncpa [#allocation3 + $0x1], 1 }

</bundles_post_ra>
